<compile_context>
chip_gen: v7x
topology: tpu7x:2x2x1
jax: 0.10.0
libtpu: 0.0.40
codegen_flags: <defaults>
</compile_context>

<pallas_src>
import jax
import jax.numpy as jnp
from jax import lax
from jax.experimental import pallas as pl
from jax.experimental.pallas import tpu as pltpu

LANE = 128
SUB_CHUNK = 128     # src rows per inner block (= adj minormost/lane dim)
DST_STRIP = 32      # dst rows kept register-resident per running-max strip


def _ceil(a, m):
    return (a + m - 1) // m * m


def _pad2(x, r, c):
    return jnp.pad(x, ((0, r - x.shape[0]), (0, c - x.shape[1])))


def _chip_config():
    """Generation-dependent knobs: max node tile, scoped-VMEM cap, compute dtype."""
    kind = ""
    try:
        kind = jax.devices()[0].device_kind.lower()
    except Exception:
        pass
    big_vmem = any(v in kind for v in ("v2", "v3", "v4", "v5", "v6"))  # 128 MiB parts
    old_vpu = any(v in kind for v in ("v2", "v3", "v4", "v5"))         # no bf16 VALU
    max_tile = 512 if big_vmem else 256            # v7x: only 64 MiB VMEM
    vmem_limit = (96 if big_vmem else 48) * 1024 * 1024
    cdt = jnp.float32 if old_vpu else jnp.bfloat16
    return max_tile, vmem_limit, cdt


def _tile_and_pad(n, max_tile):
    """Node tile (multiple of 128 -> lane-dense adj blocks) and padded node count."""
    n128 = _ceil(max(n, 1), LANE)
    if n128 <= max_tile:
        return n128, n128
    return max_tile, _ceil(n128, max_tile)


def _pack_adj(adj, nd_pad, ns_pad, dtype):
    """[Nd, Ns] 0/1 -> chunk-major [Ns_pad/128, Nd_pad, 128].

    The kernel then only indexes the src-chunk axis dynamically (leading dim)
    and never needs a dynamic lane-dim slice; every adj block is lane-dense.
    """
    a = jnp.pad(adj, ((0, nd_pad - adj.shape[0]), (0, ns_pad - adj.shape[1])))
    a = a.reshape(nd_pad, ns_pad // SUB_CHUNK, SUB_CHUNK)
    return jnp.transpose(a, (1, 0, 2)).astype(dtype)


# ----------------------------- Pallas kernels --------------------------------

def _pool_mlp_kernel(x_ref, w_ref, b_ref, o_ref):
    # h_pool = relu(x_src @ W_pool + b_pool); bf16 MXU operands, f32 accumulate.
    h = jnp.dot(x_ref[...].astype(jnp.bfloat16), w_ref[...],
                preferred_element_type=jnp.float32)
    o_ref[...] = jnp.maximum(h + b_ref[...], 0.0).astype(o_ref.dtype)


def pool_mlp(x_src, w_pool, b_pool, *, tile, out_dtype, vmem_limit):
    Ns, Din = x_src.shape
    Dh = w_pool.shape[1]
    return pl.pallas_call(
        _pool_mlp_kernel,
        grid=(Ns // tile,),
        out_shape=jax.ShapeDtypeStruct((Ns, Dh), out_dtype),
        in_specs=[pl.BlockSpec((tile, Din), lambda i: (i, 0)),
                  pl.BlockSpec((Din, Dh), lambda i: (0, 0)),
                  pl.BlockSpec((1, Dh), lambda i: (0, 0))],
        out_specs=pl.BlockSpec((tile, Dh), lambda i: (i, 0)),
        compiler_params=pltpu.CompilerParams(
            dimension_semantics=("parallel",),
            vmem_limit_bytes=vmem_limit),
    )(x_src, w_pool, b_pool)


def _sage_body(x_dst_ref, hp_ref, adj_ref, w_cat_ref, bias_ref, acc_ref,
               o_ref, agg_ref):
    k = pl.program_id(1)

    # 0 is both the max identity (h_pool >= 0, adj in {0,1}) and the DGL value
    # for zero-in-degree destinations.
    @pl.when(k == 0)
    def _init():
        agg_ref[...] = jnp.zeros(agg_ref.shape, agg_ref.dtype)

    n_chunks, td, _ = adj_ref.shape
    strip = DST_STRIP if td % DST_STRIP == 0 else 8
    n_strips = td // strip

    def strip_body(si, carry):
        r0 = pl.multiple_of(si * strip, strip)

        def chunk_body(c, agg_s):
            c0 = pl.multiple_of(c * SUB_CHUNK, SUB_CHUNK)
            a_c = adj_ref[c, pl.ds(r0, strip), :]           # [strip, 128]
            hp_c = hp_ref[pl.ds(c0, SUB_CHUNK), :]          # [128, Din]
            # Row-wise running max: 1 mul + 1 max per element, no 3-D temp,
            # no XLU reduce, agg strip stays register-resident.
            for s in range(SUB_CHUNK):                      # static unroll
                agg_s = jnp.maximum(agg_s, a_c[:, s:s + 1] * hp_c[s:s + 1, :])
            return agg_s

        agg0 = agg_ref[pl.ds(r0, strip), :]
        agg_ref[pl.ds(r0, strip), :] = lax.fori_loop(0, n_chunks, chunk_body, agg0)
        return carry

    lax.fori_loop(0, n_strips, strip_body, 0)

    # Finalize on the last src tile: single K=2*Din matmul against the stacked
    # [W_self; W_neigh] weight, plus bias and (optionally) the running
    # per-dst-type relation accumulator (HeteroGraphConv 'sum').
    @pl.when(k == pl.num_programs(1) - 1)
    def _finalize():
        xd = x_dst_ref[...].astype(jnp.bfloat16)
        ag = agg_ref[...].astype(jnp.bfloat16)
        cat = jnp.concatenate([xd, ag], axis=1)             # [td, 2*Din]
        out = jnp.dot(cat, w_cat_ref[...], preferred_element_type=jnp.float32)
        out = out + bias_ref[...]
        if acc_ref is not None:
            out = out + acc_ref[...]
        o_ref[...] = out


def _sage_kernel_noacc(x_dst_ref, hp_ref, adj_ref, w_cat_ref, bias_ref,
                       o_ref, agg_ref):
    _sage_body(x_dst_ref, hp_ref, adj_ref, w_cat_ref, bias_ref, None,
               o_ref, agg_ref)


def _sage_kernel_acc(x_dst_ref, hp_ref, adj_ref, w_cat_ref, bias_ref, acc_ref,
                     o_ref, agg_ref):
    _sage_body(x_dst_ref, hp_ref, adj_ref, w_cat_ref, bias_ref, acc_ref,
               o_ref, agg_ref)


def sage_pool_conv(x_dst, h_pool, adj3, w_cat, bias, acc, *, td, ts, vmem_limit):
    """SAGEConv('pool') neighbor max-aggregation + fused output projection.

    `acc` (or None for the first relation of a dst type) is the running
    per-dst-type relation sum; when present it is aliased with the output.
    """
    Nd, Din = x_dst.shape
    Ns = h_pool.shape[0]
    Dout = w_cat.shape[1]
    assert Nd % td == 0 and Ns % ts == 0 and ts % SUB_CHUNK == 0

    in_specs = [
        pl.BlockSpec((td, Din), lambda i, k: (i, 0)),                  # x_dst (f32)
        pl.BlockSpec((ts, Din), lambda i, k: (k, 0)),                  # h_pool (cdt)
        pl.BlockSpec((ts // SUB_CHUNK, td, SUB_CHUNK),
                     lambda i, k: (k, i, 0)),                          # adj chunk-major
        pl.BlockSpec((2 * Din, Dout), lambda i, k: (0, 0)),            # [W_self; W_neigh]
        pl.BlockSpec((1, Dout), lambda i, k: (0, 0)),                  # bias (f32)
    ]
    args = [x_dst, h_pool, adj3, w_cat, bias]
    if acc is None:
        kernel = _sage_kernel_noacc
        io_alias = {}
    else:
        kernel = _sage_kernel_acc
        in_specs.append(pl.BlockSpec((td, Dout), lambda i, k: (i, 0)))  # accumulator
        args.append(acc)
        io_alias = {5: 0}

    # TODO(synk): if profiling shows the hp/adj DMAs become exposed after the
    # faster inner loop, add pipeline_mode=pl.Buffered(3) to those BlockSpecs.
    return pl.pallas_call(
        kernel,
        grid=(Nd // td, Ns // ts),                  # (dst tiles, src reduction)
        out_shape=jax.ShapeDtypeStruct((Nd, Dout), jnp.float32),
        in_specs=in_specs,
        out_specs=pl.BlockSpec((td, Dout), lambda i, k: (i, 0)),
        scratch_shapes=[pltpu.VMEM((td, Din), h_pool.dtype)],   # running max
        input_output_aliases=io_alias,
        compiler_params=pltpu.CompilerParams(
            dimension_semantics=("parallel", "arbitrary"),
            vmem_limit_bytes=vmem_limit),
    )(*args)


# -------------------------- pure-JAX reference -------------------------------

def _sage_ref(x_src, x_dst, adj, params):
    w_pool, b_pool, w_self, w_neigh, bias = params
    h_pool = jax.nn.relu(x_src @ w_pool + b_pool[None, :])
    masked = jnp.where(adj[:, :, None] > 0, h_pool[None, :, :], -1e30)
    agg = jnp.max(masked, axis=1)
    agg = jnp.where(adj.sum(axis=1, keepdims=True) > 0, agg, 0.0)
    return x_dst @ w_self + agg @ w_neigh + bias[None, :]


# ------------------------------- HinSAGE -------------------------------------

class HinSAGEPallas:
    """Deterministically-initialized HinSAGE; forward runs every SAGEConv in Pallas."""

    def __init__(self, rel_defs, in_dim, out_dim, num_hidden_layers, key, *,
                 compute_dtype, vmem_limit):
        # rel_defs: list of (rel_name, src_ntype, dst_ntype)
        self.rel_defs = rel_defs
        self.cdt = compute_dtype
        self.vmem_limit = vmem_limit
        dims = [(in_dim, in_dim)] * (1 + num_hidden_layers) + [(in_dim, out_dim)]
        self.layer_params = []       # unpadded f32 (reference)
        self.layer_params_pad = []   # padded, weights in bf16 (kernel)
        for (din, dout) in dims:
            dp_in, dp_out = _ceil(din, LANE), _ceil(dout, LANE)
            rp, rpp = {}, {}
            for (rel, _, _) in rel_defs:
                key, *ks = jax.random.split(key, 6)
                w_pool = 0.1 * jax.random.normal(ks[0], (din, din), jnp.float32)
                b_pool = 0.1 * jax.random.normal(ks[1], (din,), jnp.float32)
                w_self = 0.1 * jax.random.normal(ks[2], (din, dout), jnp.float32)
                w_neigh = 0.1 * jax.random.normal(ks[3], (din, dout), jnp.float32)
                bias = 0.1 * jax.random.normal(ks[4], (dout,), jnp.float32)
                rp[rel] = (w_pool, b_pool, w_self, w_neigh, bias)
                w_cat = jnp.concatenate(
                    [_pad2(w_self, dp_in, dp_out), _pad2(w_neigh, dp_in, dp_out)],
                    axis=0).astype(jnp.bfloat16)              # [2*Din, Dout]
                rpp[rel] = (
                    _pad2(w_pool, dp_in, dp_in).astype(jnp.bfloat16),
                    _pad2(b_pool[None, :], 1, dp_in),          # f32
                    w_cat,
                    _pad2(bias[None, :], 1, dp_out),           # f32
                )
            self.layer_params.append(rp)
            self.layer_params_pad.append(rpp)

    # dropout=0.0 -> feat_drop is the identity (omitted).
    def forward_pallas(self, h_pad, adj_pack, tiles):
        for rpp in self.layer_params_pad:
            new_h = {}
            for (rel, src_t, dst_t) in self.rel_defs:
                w_pool, b_pool, w_cat, bias = rpp[rel]
                # pool MLP computed once per relation (not per dst tile)
                hp = pool_mlp(h_pad[src_t], w_pool, b_pool,
                              tile=tiles[src_t], out_dtype=self.cdt,
                              vmem_limit=self.vmem_limit)
                acc = new_h.get(dst_t)   # None -> skip the all-zero acc HBM read
                new_h[dst_t] = sage_pool_conv(
                    h_pad[dst_t], hp, adj_pack[rel], w_cat, bias, acc,
                    td=tiles[dst_t], ts=tiles[src_t], vmem_limit=self.vmem_limit)
            h_pad = new_h                        # HeteroGraphConv aggregate='sum'
        return h_pad

    def forward_ref(self, h, adj):
        for rp in self.layer_params:
            new_h = {}
            for (rel, src_t, dst_t) in self.rel_defs:
                out = _sage_ref(h[src_t], h[dst_t], adj[rel], rp[rel])
                new_h[dst_t] = out if dst_t not in new_h else new_h[dst_t] + out
            h = new_h
        return h


# --------------------------------- main ---------------------------------------

if __name__ == "__main__":
    key = jax.random.PRNGKey(0)
    in_dim, out_dim, num_hidden = 32, 16, 1
    Nu, Ni = 6, 5                                   # user / item node counts

    # heterogeneous graph: user--buys-->item, item--bought_by-->user,
    # user--follows-->user (two relations on dst "user" exercises the acc path).
    rel_defs = [("buys", "user", "item"),
                ("bought_by", "item", "user"),
                ("follows", "user", "user")]

    key, k1, k2, k3, k4, k5 = jax.random.split(key, 6)
    h = {"user": jax.random.normal(k1, (Nu, in_dim), jnp.float32),
         "item": jax.random.normal(k2, (Ni, in_dim), jnp.float32)}
    adj = {"buys": (jax.random.uniform(k3, (Ni, Nu)) < 0.5).astype(jnp.float32),
           "bought_by": (jax.random.uniform(k4, (Nu, Ni)) < 0.5).astype(jnp.float32),
           "follows": (jax.random.uniform(k5, (Nu, Nu)) < 0.4).astype(jnp.float32)}

    max_tile, vmem_limit, cdt = _chip_config()
    model = HinSAGEPallas(rel_defs, in_dim, out_dim, num_hidden, key,
                          compute_dtype=cdt, vmem_limit=vmem_limit)

    # per-node-type tiles; node counts padded to x128 (lane-dense adjacency),
    # feature dims padded to x128 lanes.
    counts = {"user": Nu, "item": Ni}
    tiles, n_pad = {}, {}
    for t, n in counts.items():
        tiles[t], n_pad[t] = _tile_and_pad(n, max_tile)
    dp_in = _ceil(in_dim, LANE)

    h_pad = {t: _pad2(h[t], n_pad[t], dp_in) for t in h}
    adj_pack = {rel: _pack_adj(adj[rel], n_pad[dst_t], n_pad[src_t], cdt)
                for (rel, src_t, dst_t) in rel_defs}

    out_pad = model.forward_pallas(h_pad, adj_pack, tiles)
    out_pad = jax.tree_util.tree_map(jax.block_until_ready, out_pad)

    out = {"user": out_pad["user"][:Nu, :out_dim],
           "item": out_pad["item"][:Ni, :out_dim]}
    ref = model.forward_ref(h, adj)

    for t in ("user", "item"):
        assert out[t].shape == ref[t].shape
        # bf16 MXU operands / bf16 h_pool (f32 accumulation) vs pure-f32 reference
        assert jnp.allclose(out[t], ref[t], atol=5e-2, rtol=5e-2), f"mismatch for {t}"

    print("KERNEL_OK")
</pallas_src>

<mosaic_0001>
module attributes {stable_mosaic.version = 11 : i64} {
  func.func @_pool_mlp_kernel(%arg0: i32, %arg1: memref<128x128xf32, #tpu.memory_space<vmem>>, %arg2: memref<128x128xbf16, #tpu.memory_space<vmem>>, %arg3: memref<1x128xf32, #tpu.memory_space<vmem>>, %arg4: memref<128x128xbf16, #tpu.memory_space<vmem>>) attributes {dimension_semantics = [#tpu.dimension_semantics<parallel>], iteration_bounds = array<i64: 1>, scalar_prefetch = 0 : i64, scratch_operands = 0 : i64, tpu.core_type = #tpu.core_type<tc>, window_params = [{transform_indices = @transform_0, window_bounds = array<i64: 128, 128>}, {pipeline_mode = #tpu.pipeline_mode<synchronous>, transform_indices = @transform_1, window_bounds = array<i64: 128, 128>}, {pipeline_mode = #tpu.pipeline_mode<synchronous>, transform_indices = @transform_2, window_bounds = array<i64: 1, 128>}, {transform_indices = @transform_3, window_bounds = array<i64: 128, 128>}]} {
    %c0 = arith.constant 0 : index
    %c0_0 = arith.constant 0 : index
    %0 = vector.load %arg1[%c0, %c0_0] : memref<128x128xf32, #tpu.memory_space<vmem>>, vector<128x128xf32>
    %1 = arith.truncf %0 : vector<128x128xf32> to vector<128x128xbf16>
    %c0_1 = arith.constant 0 : index
    %c0_2 = arith.constant 0 : index
    %2 = vector.load %arg2[%c0_1, %c0_2] : memref<128x128xbf16, #tpu.memory_space<vmem>>, vector<128x128xbf16>
    %cst = arith.constant dense<0.000000e+00> : vector<128x128xf32>
    %3 = tpu.matmul %1, %2, %cst {dimension_numbers = #tpu.dot_dimension_numbers<[1], [0], [0], [1], [0, 0, 1, 1], [], []>} : vector<128x128xbf16>, vector<128x128xbf16>, vector<128x128xf32> -> vector<128x128xf32>
    %c0_3 = arith.constant 0 : index
    %c0_4 = arith.constant 0 : index
    %4 = vector.load %arg3[%c0_3, %c0_4] : memref<1x128xf32, #tpu.memory_space<vmem>>, vector<1x128xf32>
    %5 = vector.broadcast %4 : vector<1x128xf32> to vector<128x128xf32>
    %6 = arith.addf %3, %5 : vector<128x128xf32>
    %cst_5 = arith.constant 0.000000e+00 : f32
    %7 = vector.broadcast %cst_5 : f32 to vector<128x128xf32>
    %8 = arith.maximumf %6, %7 : vector<128x128xf32>
    %9 = arith.truncf %8 : vector<128x128xf32> to vector<128x128xbf16>
    %c0_6 = arith.constant 0 : index
    %c0_7 = arith.constant 0 : index
    %10 = vector.load %arg4[%c0_6, %c0_7] : memref<128x128xbf16, #tpu.memory_space<vmem>>, vector<128x128xbf16>
    tpu.vector_store %arg4[%c0_6, %c0_7], %9 {strides = array<i32>} : memref<128x128xbf16, #tpu.memory_space<vmem>>, vector<128x128xbf16>,
    return
  }
  func.func @transform_0(%arg0: i32) -> (i32, i32) {
    %c0_i32 = arith.constant 0 : i32
    %c0_i32_0 = arith.constant 0 : i32
    return %arg0, %c0_i32 : i32, i32
  }
  func.func @transform_1(%arg0: i32) -> (i32, i32) {
    %c0_i32 = arith.constant 0 : i32
    %c0_i32_0 = arith.constant 0 : i32
    %c0_i32_1 = arith.constant 0 : i32
    return %c0_i32, %c0_i32_0 : i32, i32
  }
  func.func @transform_2(%arg0: i32) -> (i32, i32) {
    %c0_i32 = arith.constant 0 : i32
    %c0_i32_0 = arith.constant 0 : i32
    %c0_i32_1 = arith.constant 0 : i32
    return %c0_i32, %c0_i32_0 : i32, i32
  }
  func.func @transform_3(%arg0: i32) -> (i32, i32) {
    %c0_i32 = arith.constant 0 : i32
    %c0_i32_0 = arith.constant 0 : i32
    return %arg0, %c0_i32 : i32, i32
  }
}

</mosaic_0001>

<bundles_post_ra>
// kernel: tpu_custom_call.1
= control target key start
LH: loop header
LB: loop body
LE: loop exit
PB: predicated region body
PF: predicated region fallthrough
CT: control target
= control target key end

     0   :  { %8 = vsyncpa [#allocation3], 0  ;;  %s661_s0 = inlined_call_operand.hbm [shape: f32[128,128], index: 0, kind: input, shape index: {}]   ;;  %s662_s1 = inlined_call_operand.hbm [shape: bf16[128,128], index: 1, kind: input, shape index: {}]   ;;  %s663_s2 = inlined_call_operand.vmem [shape: f32[1,128], index: 2, kind: input, shape index: {}]   ;;  %s664_s3 = inlined_call_operand.hbm [shape: bf16[128,128], index: 3, kind: output, shape index: {}]  }
   0x1   :  { %9 = vsyncpa [#allocation6], 0 }
   0x2   :  { %10 = vsyncpa [#allocation4], 0  ;;  %s589_s12 = smov [#allocation2]   ;;  %s517_s16 = scalar_lea.hbm %s661_s0, 2048 }
   0x3   :  { %s16_s13 = sshll.u32 %s589_s12, 4  ;;  %p518_p0 = scmp.ne.s32.totalorder %s661_s0, %s517_s16  ;;  %s17_s13 = int_to_ptr.vmem [resolvable:$true] %s16_s13 }
   0x4   :  { %p521_p1 = scmp.lt.u32.totalorder %s517_s16, %s661_s0 }
   0x6   :  { %p523_p2 = pnand %p521_p1, %p518_p0 }
   0x8   :  { %526 = shalt.err (!%p523_p2)
}
   0x9   :  { %s527_s21 = scalar_lea.vmem %s17_s13, 2048  ;;  %p532_p4 = scmp.lt.s32.totalorder %s17_s13, %s17_s13 }
   0xa   :  { %p528_p3 = scmp.ne.s32.totalorder %s17_s13, %s527_s21  ;;  %p533_p5 = scmp.lt.s32.totalorder %s527_s21, %s527_s21 }
   0xc   :  { %p534_p6 = por %p533_p5, %p532_p4 }
   0xe   :  { %p535_p7 = pnand %p534_p6, %p528_p3 }
  0x10   :  { %538 = shalt.err (!%p535_p7)
}
  0x11   :  { %s590_s22 = smov 128   ;;  %s591_s23 = smov 8  }
  0x12   :  { %22 = dma.hbm_to_vmem [thread:$0]  %s661_s0, 2048, %s17_s13, [#allocation3], %s590_s22, %s590_s22, %s591_s23  }
  0x13   :  { %s592_s26 = smov [#allocation5]   ;;  %s539_s30 = scalar_lea.hbm %s662_s1, 1024 }
  0x14   :  { %s28_s27 = sshll.u32 %s592_s26, 4  ;;  %p540_p8 = scmp.ne.s32.totalorder %s662_s1, %s539_s30  ;;  %s29_s27 = int_to_ptr.vmem [resolvable:$true] %s28_s27 }
  0x15   :  { %p543_p9 = scmp.lt.u32.totalorder %s539_s30, %s662_s1 }
  0x17   :  { %p545_p10 = pnand %p543_p9, %p540_p8 }
  0x19   :  { %548 = shalt.err (!%p545_p10)
}
  0x1a   :  { %s549_s8 = scalar_lea.vmem %s29_s27, 1024  ;;  %p554_p12 = scmp.lt.s32.totalorder %s29_s27, %s29_s27 }
  0x1b   :  { %p550_p11 = scmp.ne.s32.totalorder %s29_s27, %s549_s8  ;;  %p555_p13 = scmp.lt.s32.totalorder %s549_s8, %s549_s8 }
  0x1d   :  { %p556_p0 = por %p555_p13, %p554_p12 }
  0x1f   :  { %p557_p1 = pnand %p556_p0, %p550_p11 }
  0x21   :  { %560 = shalt.err (!%p557_p1)
}
  0x22   :  { %s593_s0 = smov 64   ;;  %s594_s9 = smov 4  }
  0x23   :  { %34 = dma.hbm_to_vmem [thread:$0]  %s662_s1, 1024, %s29_s27, [#allocation6], %s593_s0, %s593_s0, %s594_s9  }
  0x24   :  { %583 = dma.done.wait [#allocation3], 2048  }
  0x25   :  { %584 = vsyncadd [#allocation3], 4294965248 }
  0x26   :  { %585 = dma.done.wait [#allocation6], 1024  }
  0x27   :  { %586 = vsyncadd [#allocation6], 4294966272  ;;  %v509_v0 = vld [vmem:[#allocation5] sm:$0xff]   ;;  %v510_v1 = vld [vmem:[#allocation5 + $0x8] sm:$0xff]  }
  0x28   :  { %454 = vmatprep.subr.bf16.mxu0 %v509_v0  ;;  %486 = vmatprep.subr.bf16.mxu1 %v509_v0  ;;  %v511_v2 = vld [vmem:[#allocation5 + $0x10] sm:$0xff]   ;;  %v512_v3 = vld [vmem:[#allocation5 + $0x18] sm:$0xff]   ;;  %v44_v4 = vld [vmem:[#allocation2] sm:$0xff] }
  0x29   :  { %455 = vmatpush3.bf16.msra.mxu0 %v509_v0  ;;  %494 = vmatpush3.bf16.msra.mxu1 %v509_v0  ;;  %v45_v5 = vld [vmem:[#allocation2 + $0x8] sm:$0xff]  ;;  %v52_v6 = vld [vmem:[#allocation2 + $0x40] sm:$0xff]  ;;  %v515_v12 = vld [vmem:[#allocation5 + $0x30] sm:$0xff]  }
  0x2a   :  { %456 = vmatprep.subr.bf16.mxu0 %v510_v1  ;;  %487 = vmatprep.subr.bf16.mxu1 %v510_v1  ;;  %v60_v7 = vpack.c.bf16 %v45_v5, %v44_v4  ;;  %v53_v8 = vld [vmem:[#allocation2 + $0x48] sm:$0xff]  ;;  %v513_v10 = vld [vmem:[#allocation5 + $0x20] sm:$0xff]   ;;  %v516_v13 = vld [vmem:[#allocation5 + $0x38] sm:$0xff]  }
  0x2b   :  { %v64_v9 = vpack.c.bf16 %v53_v8, %v52_v6  ;;  %v514_v11 = vld [vmem:[#allocation5 + $0x28] sm:$0xff]   ;;  %v46_v14 = vld [vmem:[#allocation2 + $0x10] sm:$0xff]  ;;  %v47_v15 = vld [vmem:[#allocation2 + $0x18] sm:$0xff] }
  0x2c   :  { %470 = vmatprep.mubr.bf16.mxu0 %v60_v7  ;;  %v54_v16 = vld [vmem:[#allocation2 + $0x50] sm:$0xff]  ;;  %v55_v17 = vld [vmem:[#allocation2 + $0x58] sm:$0xff]  ;;  %v48_v18 = vld [vmem:[#allocation2 + $0x20] sm:$0xff]  ;;  %v61_v22 = vpack.c.bf16 %v47_v15, %v46_v14 }
  0x2d   :  { %457 = vmatpush3.bf16.msra.mxu0 %v510_v1  ;;  %495 = vmatpush3.bf16.msra.mxu1 %v510_v1  ;;  %v49_v19 = vld [vmem:[#allocation2 + $0x28] sm:$0xff]  ;;  %v56_v20 = vld [vmem:[#allocation2 + $0x60] sm:$0xff]  ;;  %v65_v23 = vpack.c.bf16 %v55_v17, %v54_v16  ;;  %v50_v26 = vld [vmem:[#allocation2 + $0x30] sm:$0xff] }
  0x2e   :  { %458 = vmatprep.subr.bf16.mxu0 %v511_v2  ;;  %488 = vmatprep.subr.bf16.mxu1 %v511_v2  ;;  %v57_v21 = vld [vmem:[#allocation2 + $0x68] sm:$0xff]  ;;  %v62_v24 = vpack.c.bf16 %v49_v19, %v48_v18  ;;  %v51_v27 = vld [vmem:[#allocation2 + $0x38] sm:$0xff]  ;;  %v58_v28 = vld [vmem:[#allocation2 + $0x70] sm:$0xff] }
  0x2f   :  { %478 = vmatprep.mubr.bf16.mxu1 %v64_v9  ;;  %v66_v25 = vpack.c.bf16 %v57_v21, %v56_v20  ;;  %v59_v29 = vld [vmem:[#allocation2 + $0x78] sm:$0xff]  ;;  %v63_v30 = vpack.c.bf16 %v51_v27, %v50_v26  ;;  %v350_v32 = vld [vmem:[%s663_s2] ss:$0 sm:$0xff]  ;;  %s595_s2 = smov [#allocation7]  }
  0x30   :  { %v67_v31 = vpack.c.bf16 %v59_v29, %v58_v28  ;;  %s337_s13 = sshll.u32 %s595_s2, 4  ;;  %s338_s13 = int_to_ptr.vmem [resolvable:$true] %s337_s13 }
  0x31   :  { %459 = vmatpush3.bf16.msra.mxu0 %v511_v2  ;;  %496 = vmatpush3.bf16.msra.mxu1 %v511_v2  ;;  %s561_s14 = scalar_lea.vmem %s338_s13, 1024  ;;  %p566_p3 = scmp.lt.s32.totalorder %s338_s13, %s338_s13 }
  0x32   :  { %460 = vmatprep.subr.bf16.mxu0 %v512_v3  ;;  %489 = vmatprep.subr.bf16.mxu1 %v512_v3  ;;  %p562_p2 = scmp.ne.s32.totalorder %s338_s13, %s561_s14  ;;  %p567_p4 = scmp.lt.s32.totalorder %s561_s14, %s561_s14 }
  0x34   :  { %p568_p5 = por %p567_p4, %p566_p3 }
  0x35   :  { %461 = vmatpush3.bf16.msra.mxu0 %v512_v3  ;;  %497 = vmatpush3.bf16.msra.mxu1 %v512_v3 }
  0x36   :  { %462 = vmatprep.subr.bf16.mxu0 %v513_v10  ;;  %490 = vmatprep.subr.bf16.mxu1 %v513_v10  ;;  %p569_p6 = pnand %p568_p5, %p562_p2 }
  0x39   :  { %463 = vmatpush3.bf16.msra.mxu0 %v513_v10  ;;  %498 = vmatpush3.bf16.msra.mxu1 %v513_v10 }
  0x3a   :  { %464 = vmatprep.subr.bf16.mxu0 %v514_v11  ;;  %491 = vmatprep.subr.bf16.mxu1 %v514_v11 }
  0x3d   :  { %465 = vmatpush3.bf16.msra.mxu0 %v514_v11  ;;  %499 = vmatpush3.bf16.msra.mxu1 %v514_v11 }
  0x3e   :  { %466 = vmatprep.subr.bf16.mxu0 %v515_v12  ;;  %492 = vmatprep.subr.bf16.mxu1 %v515_v12 }
  0x41   :  { %467 = vmatpush3.bf16.msra.mxu0 %v515_v12  ;;  %500 = vmatpush3.bf16.msra.mxu1 %v515_v12 }
  0x42   :  { %468 = vmatprep.subr.bf16.mxu0 %v516_v13  ;;  %493 = vmatprep.subr.bf16.mxu1 %v516_v13 }
  0x45   :  { %469 = vmatpush3.bf16.msra.mxu0 %v516_v13  ;;  %501 = vmatpush3.bf16.msra.mxu1 %v516_v13 }
  0x48   :  { %471 = vmatmul.mubr.bf16.vlgmr.msra.gmra.mrb[0].mxu0 %v61_v22  ;;  %479 = vmatmul.mubr.bf16.vlgmr.msra.gmra.mrb[0].mxu1 %v65_v23 }
  0x49   :  { %474 = vmatprep.mubr.bf16.mxu0 %v62_v24  ;;  %482 = vmatprep.mubr.bf16.mxu1 %v66_v25 }
  0x50   :  { %475 = vmatmul.mubr.bf16.gmra.mrb[4].mxu0 %v63_v30  ;;  %483 = vmatmul.mubr.bf16.gmra.mrb[4].mxu1 %v67_v31 }
 0x11b   :  { %v472_v33 = vpop.f32.mrb[0].mxu0  ;;  %v480_v34 = vpop.f32.mrb[0].mxu1 }
 0x11c   :  { %v182_v35 = vadd.f32 %v472_v33, %v350_v32  ;;  %v214_v36 = vadd.f32 %v480_v34, %v350_v32  ;;  %v173_v37 = vpop.f32.mrb[1].mxu0  ;;  %v205_v38 = vpop.f32.mrb[1].mxu1 }
 0x11d   :  { %v174_v39 = vadd.f32 %v350_v32, %v173_v37  ;;  %v206_v40 = vadd.f32 %v350_v32, %v205_v38  ;;  %v473_v41 = vpop.f32.mrb[2].mxu0  ;;  %v481_v42 = vpop.f32.mrb[2].mxu1 }
 0x11e   :  { %v185_v43 = vadd.f32 %v473_v41, %v350_v32  ;;  %v217_v44 = vadd.f32 %v481_v42, %v350_v32  ;;  %v176_v45 = vpop.f32.mrb[3].mxu0  ;;  %v208_v46 = vpop.f32.mrb[3].mxu1  ;;  %v238_v49 = vmax.f32 %v182_v35, 0.0  ;;  %v246_v50 = vmax.f32 %v214_v36, 0.0 }
 0x11f   :  { %v177_v47 = vadd.f32 %v350_v32, %v176_v45  ;;  %v209_v48 = vadd.f32 %v350_v32, %v208_v46  ;;  %v236_v53 = vmax.f32 %v174_v39, 0.0  ;;  %v244_v54 = vmax.f32 %v206_v40, 0.0 }
 0x120   :  { %v239_v51 = vmax.f32 %v185_v43, 0.0  ;;  %v247_v52 = vmax.f32 %v217_v44, 0.0 }
 0x121   :  { %v237_v55 = vmax.f32 %v177_v47, 0.0  ;;  %v245_v56 = vmax.f32 %v209_v48, 0.0 }
 0x122   :  { %v399_v57 = vpack.c.bf16 %v239_v51, %v238_v49  ;;  %v419_v58 = vpack.c.bf16 %v247_v52, %v246_v50 }
 0x123   :  { %v394_v59 = vpack.c.bf16 %v237_v55, %v236_v53  ;;  %v414_v60 = vpack.c.bf16 %v245_v56, %v244_v54  ;;  %v476_v61 = vpop.f32.mrb[4].mxu0  ;;  %v484_v62 = vpop.f32.mrb[4].mxu1 }
 0x124   :  { %431 = vst [vmem:[#allocation7 + $0x8] sm:$0xff] %v399_v57   ;;  %435 = vst [vmem:[#allocation7 + $0x28] sm:$0xff] %v419_v58   ;;  %v198_v63 = vadd.f32 %v476_v61, %v350_v32  ;;  %v230_v0 = vadd.f32 %v484_v62, %v350_v32  ;;  %v189_v1 = vpop.f32.mrb[5].mxu0  ;;  %v221_v2 = vpop.f32.mrb[5].mxu1 }
 0x125   :  { %395 = vst [vmem:[#allocation7] sm:$0xff] %v394_v59   ;;  %434 = vst [vmem:[#allocation7 + $0x20] sm:$0xff] %v414_v60   ;;  %v190_v3 = vadd.f32 %v350_v32, %v189_v1  ;;  %v222_v4 = vadd.f32 %v350_v32, %v221_v2  ;;  %v477_v5 = vpop.f32.mrb[6].mxu0  ;;  %v485_v6 = vpop.f32.mrb[6].mxu1 }
 0x126   :  { %v201_v7 = vadd.f32 %v477_v5, %v350_v32  ;;  %v233_v8 = vadd.f32 %v485_v6, %v350_v32  ;;  %v192_v9 = vpop.f32.mrb[7].mxu0  ;;  %v224_v10 = vpop.f32.mrb[7].mxu1  ;;  %v242_v13 = vmax.f32 %v198_v63, 0.0  ;;  %v250_v14 = vmax.f32 %v230_v0, 0.0 }
 0x127   :  { %v193_v11 = vadd.f32 %v350_v32, %v192_v9  ;;  %v225_v12 = vadd.f32 %v350_v32, %v224_v10  ;;  %v240_v17 = vmax.f32 %v190_v3, 0.0  ;;  %v248_v18 = vmax.f32 %v222_v4, 0.0 }
 0x128   :  { %v243_v15 = vmax.f32 %v201_v7, 0.0  ;;  %v251_v16 = vmax.f32 %v233_v8, 0.0 }
 0x129   :  { %v241_v19 = vmax.f32 %v193_v11, 0.0  ;;  %v249_v20 = vmax.f32 %v225_v12, 0.0 }
 0x12a   :  { %v409_v21 = vpack.c.bf16 %v243_v15, %v242_v13  ;;  %v429_v22 = vpack.c.bf16 %v251_v16, %v250_v14 }
 0x12b   :  { %v404_v23 = vpack.c.bf16 %v241_v19, %v240_v17  ;;  %v424_v24 = vpack.c.bf16 %v249_v20, %v248_v18 }
 0x12c   :  { %433 = vst [vmem:[#allocation7 + $0x18] sm:$0xff] %v409_v21   ;;  %437 = vst [vmem:[#allocation7 + $0x38] sm:$0xff] %v429_v22  }
 0x12d   :  { %432 = vst [vmem:[#allocation7 + $0x10] sm:$0xff] %v404_v23   ;;  %436 = vst [vmem:[#allocation7 + $0x30] sm:$0xff] %v424_v24  }
 0x12e   :  { %572 = shalt.err (!%p569_p6)
}
 0x12f   :  { %s573_s17 = scalar_lea.hbm %s664_s3, 1024 }
 0x130   :  { %p574_p7 = scmp.ne.s32.totalorder %s664_s3, %s573_s17  ;;  %p577_p8 = scmp.lt.u32.totalorder %s573_s17, %s664_s3 }
 0x132   :  { %p579_p9 = pnand %p577_p8, %p574_p7 }
 0x134   :  { %582 = shalt.err (!%p579_p9)
}
 0x135   :  { %343 = dma.vmem_to_hbm [thread:$0]  %s338_s13, 1024, %s664_s3, [#allocation4], %s593_s0, %s593_s0, %s594_s9  }
 0x136   :  { %587 = dma.done.wait [#allocation4], 1024  }
 0x137   :  { %588 = vsyncadd [#allocation4], 4294966272 }
 0x138   :  { %347 = vsyncpa [#allocation3], 1 }
 0x139   :  { %348 = vsyncpa [#allocation6], 1 }
 0x13a   :  { %349 = vsyncpa [#allocation4], 1 }

</bundles_post_ra>
